<compile_context>
chip_gen: v6e
topology: v6e:2x2x1
jax: 0.10.0
libtpu: 0.0.40
codegen_flags: <defaults>
</compile_context>

<pallas_src>
import functools

import jax
import jax.numpy as jnp
from jax.experimental import pallas as pl
from jax.experimental.pallas import tpu as pltpu


def add_norm_kernel(x_ref, y_ref, g_ref, b_ref, o_ref, *, eps, hidden):
    # x_ref / y_ref / o_ref: (TM, H) row tiles; g_ref / b_ref: (1, H)
    h = x_ref[...].astype(jnp.float32) + y_ref[...].astype(jnp.float32)
    mean = jnp.mean(h, axis=-1, keepdims=True)
    centered = h - mean
    # torch.std uses the unbiased estimator (divide by N - 1).
    denom = float(max(hidden - 1, 1))
    var = jnp.sum(centered * centered, axis=-1, keepdims=True) / denom
    std = jnp.sqrt(var)
    inv = 1.0 / (std + eps)
    out = (g_ref[...].astype(jnp.float32) * (centered * inv)
           + b_ref[...].astype(jnp.float32))
    o_ref[...] = out.astype(o_ref.dtype)


def _round_up(x, m):
    return ((x + m - 1) // m) * m


def add_norm(x, y, gamma, beta, *, eps=1e-6, tile_rows=512):
    """AddNorm forward: layer_norm(dropout(y) + x), dropout in eval mode.

    x, y: (..., H); gamma, beta: (H,).
    """
    assert x.shape == y.shape
    orig_shape = x.shape
    H = x.shape[-1]
    rows = x.size // H

    x2d = x.reshape(rows, H)
    y2d = y.reshape(rows, H)
    g2d = gamma.reshape(1, H)
    b2d = beta.reshape(1, H)

    # Row tile: multiple of 8 sublanes, capped so x/y/out tiles (double
    # buffered by the pipeline, counted at fp32 width) stay under ~24 MiB.
    bytes_per_row = 3 * 2 * H * 4
    max_tm = max(8, ((24 * 1024 * 1024) // bytes_per_row) // 8 * 8)
    tm = max(8, min(_round_up(tile_rows, 8), max_tm, _round_up(rows, 8)))

    rows_p = _round_up(rows, tm)
    if rows_p != rows:
        pad = rows_p - rows
        x2d = jnp.pad(x2d, ((0, pad), (0, 0)))
        y2d = jnp.pad(y2d, ((0, pad), (0, 0)))

    grid = (rows_p // tm,)
    kernel = functools.partial(add_norm_kernel, eps=eps, hidden=H)

    out2d = pl.pallas_call(
        kernel,
        out_shape=jax.ShapeDtypeStruct((rows_p, H), x.dtype),
        grid_spec=pltpu.PrefetchScalarGridSpec(
            num_scalar_prefetch=0,
            grid=grid,
            in_specs=[
                pl.BlockSpec((tm, H), lambda i: (i, 0)),   # x row tile
                pl.BlockSpec((tm, H), lambda i: (i, 0)),   # y row tile
                pl.BlockSpec((1, H), lambda i: (0, 0)),    # gamma
                pl.BlockSpec((1, H), lambda i: (0, 0)),    # beta
            ],
            out_specs=pl.BlockSpec((tm, H), lambda i: (i, 0)),
        ),
        compiler_params=pltpu.CompilerParams(
            dimension_semantics=("parallel",)),
    )(x2d, y2d, g2d, b2d)

    return out2d[:rows].reshape(orig_shape)


if __name__ == "__main__":
    batch, seq, hidden = 2, 8, 128   # H multiple of 128 -> lane-dense stores
    eps = 1e-6

    key = jax.random.PRNGKey(0)
    kx, ky, kg, kb = jax.random.split(key, 4)

    x = jax.random.normal(kx, (batch, seq, hidden), jnp.float32)
    y = jax.random.normal(ky, (batch, seq, hidden), jnp.float32)
    # Module init is gamma=ones, beta=zeros; random values here also exercise
    # the scale/shift path of the kernel.
    gamma = 1.0 + 0.1 * jax.random.normal(kg, (hidden,), jnp.float32)
    beta = 0.1 * jax.random.normal(kb, (hidden,), jnp.float32)

    out = add_norm(x, y, gamma, beta, eps=eps)
    out = jax.block_until_ready(out)

    # Pure-JAX reference mirroring the PyTorch forward (eval-mode dropout).
    h = y + x
    mean = jnp.mean(h, axis=-1, keepdims=True)
    std = jnp.std(h, axis=-1, keepdims=True, ddof=1)   # unbiased, like torch.std
    ref = gamma * (h - mean) / (std + eps) + beta

    assert out.shape == (batch, seq, hidden)
    assert jnp.allclose(out, ref, atol=1e-5, rtol=1e-5)

    print("KERNEL_OK")
</pallas_src>

<mosaic_0001>
module attributes {stable_mosaic.version = 11 : i64} {
  func.func @add_norm_kernel(%arg0: i32, %arg1: memref<16x128xf32, #tpu.memory_space<vmem>>, %arg2: memref<16x128xf32, #tpu.memory_space<vmem>>, %arg3: memref<1x128xf32, #tpu.memory_space<vmem>>, %arg4: memref<1x128xf32, #tpu.memory_space<vmem>>, %arg5: memref<16x128xf32, #tpu.memory_space<vmem>>) attributes {dimension_semantics = [#tpu.dimension_semantics<parallel>], iteration_bounds = array<i64: 1>, scalar_prefetch = 0 : i64, scratch_operands = 0 : i64, tpu.core_type = #tpu.core_type<tc>, window_params = [{transform_indices = @transform_0, window_bounds = array<i64: 16, 128>}, {transform_indices = @transform_1, window_bounds = array<i64: 16, 128>}, {pipeline_mode = #tpu.pipeline_mode<synchronous>, transform_indices = @transform_2, window_bounds = array<i64: 1, 128>}, {pipeline_mode = #tpu.pipeline_mode<synchronous>, transform_indices = @transform_3, window_bounds = array<i64: 1, 128>}, {transform_indices = @transform_4, window_bounds = array<i64: 16, 128>}]} {
    %c0 = arith.constant 0 : index
    %c0_0 = arith.constant 0 : index
    %0 = vector.load %arg1[%c0, %c0_0] : memref<16x128xf32, #tpu.memory_space<vmem>>, vector<16x128xf32>
    %c0_1 = arith.constant 0 : index
    %c0_2 = arith.constant 0 : index
    %1 = vector.load %arg2[%c0_1, %c0_2] : memref<16x128xf32, #tpu.memory_space<vmem>>, vector<16x128xf32>
    %2 = arith.addf %0, %1 : vector<16x128xf32>
    %cst = arith.constant dense<0.000000e+00> : vector<16xf32>
    %3 = vector.multi_reduction <add>, %2, %cst [1] : vector<16x128xf32> to vector<16xf32>
    %4 = vector.shape_cast %3 : vector<16xf32> to vector<16x1xf32>
    %cst_3 = arith.constant 1.280000e+02 : f32
    %5 = vector.broadcast %cst_3 : f32 to vector<16x1xf32>
    %6 = arith.divf %4, %5 : vector<16x1xf32>
    %7 = vector.broadcast %6 : vector<16x1xf32> to vector<16x128xf32>
    %8 = arith.subf %2, %7 : vector<16x128xf32>
    %9 = arith.mulf %8, %8 : vector<16x128xf32>
    %cst_4 = arith.constant dense<0.000000e+00> : vector<16xf32>
    %10 = vector.multi_reduction <add>, %9, %cst_4 [1] : vector<16x128xf32> to vector<16xf32>
    %11 = vector.shape_cast %10 : vector<16xf32> to vector<16x1xf32>
    %cst_5 = arith.constant 1.270000e+02 : f32
    %12 = vector.broadcast %cst_5 : f32 to vector<16x1xf32>
    %13 = arith.divf %11, %12 : vector<16x1xf32>
    %14 = math.sqrt %13 : vector<16x1xf32>
    %cst_6 = arith.constant 9.99999997E-7 : f32
    %15 = vector.broadcast %cst_6 : f32 to vector<16x1xf32>
    %16 = arith.addf %14, %15 : vector<16x1xf32>
    %cst_7 = arith.constant 1.000000e+00 : f32
    %17 = vector.broadcast %cst_7 : f32 to vector<16x1xf32>
    %18 = arith.divf %17, %16 : vector<16x1xf32>
    %c0_8 = arith.constant 0 : index
    %c0_9 = arith.constant 0 : index
    %19 = vector.load %arg3[%c0_8, %c0_9] : memref<1x128xf32, #tpu.memory_space<vmem>>, vector<1x128xf32>
    %20 = vector.broadcast %18 : vector<16x1xf32> to vector<16x128xf32>
    %21 = arith.mulf %8, %20 : vector<16x128xf32>
    %22 = vector.broadcast %19 : vector<1x128xf32> to vector<16x128xf32>
    %23 = arith.mulf %22, %21 : vector<16x128xf32>
    %c0_10 = arith.constant 0 : index
    %c0_11 = arith.constant 0 : index
    %24 = vector.load %arg4[%c0_10, %c0_11] : memref<1x128xf32, #tpu.memory_space<vmem>>, vector<1x128xf32>
    %25 = vector.broadcast %24 : vector<1x128xf32> to vector<16x128xf32>
    %26 = arith.addf %23, %25 : vector<16x128xf32>
    %c0_12 = arith.constant 0 : index
    %c0_13 = arith.constant 0 : index
    %27 = vector.load %arg5[%c0_12, %c0_13] : memref<16x128xf32, #tpu.memory_space<vmem>>, vector<16x128xf32>
    tpu.vector_store %arg5[%c0_12, %c0_13], %26 {strides = array<i32>} : memref<16x128xf32, #tpu.memory_space<vmem>>, vector<16x128xf32>,
    return
  }
  func.func @transform_0(%arg0: i32) -> (i32, i32) {
    %c0_i32 = arith.constant 0 : i32
    %c0_i32_0 = arith.constant 0 : i32
    return %arg0, %c0_i32 : i32, i32
  }
  func.func @transform_1(%arg0: i32) -> (i32, i32) {
    %c0_i32 = arith.constant 0 : i32
    %c0_i32_0 = arith.constant 0 : i32
    return %arg0, %c0_i32 : i32, i32
  }
  func.func @transform_2(%arg0: i32) -> (i32, i32) {
    %c0_i32 = arith.constant 0 : i32
    %c0_i32_0 = arith.constant 0 : i32
    %c0_i32_1 = arith.constant 0 : i32
    return %c0_i32, %c0_i32_0 : i32, i32
  }
  func.func @transform_3(%arg0: i32) -> (i32, i32) {
    %c0_i32 = arith.constant 0 : i32
    %c0_i32_0 = arith.constant 0 : i32
    %c0_i32_1 = arith.constant 0 : i32
    return %c0_i32, %c0_i32_0 : i32, i32
  }
  func.func @transform_4(%arg0: i32) -> (i32, i32) {
    %c0_i32 = arith.constant 0 : i32
    %c0_i32_0 = arith.constant 0 : i32
    return %arg0, %c0_i32 : i32, i32
  }
}

</mosaic_0001>

<bundles_post_ra>
// kernel: tpu_custom_call.1
= control target key start
LH: loop header
LB: loop body
LE: loop exit
PB: predicated region body
PF: predicated region fallthrough
CT: control target
= control target key end

     0   :  { %9 = vsyncpa [#allocation3], 0  ;;  %s265_s0 = inlined_call_operand.hbm [shape: f32[16,128], index: 0, kind: input, shape index: {}]   ;;  %s266_s1 = inlined_call_operand.hbm [shape: f32[16,128], index: 1, kind: input, shape index: {}]   ;;  %s267_s2 = inlined_call_operand.vmem [shape: f32[1,128], index: 2, kind: input, shape index: {}]   ;;  %s268_s3 = inlined_call_operand.vmem [shape: f32[1,128], index: 3, kind: input, shape index: {}]   ;;  %s269_s4 = inlined_call_operand.hbm [shape: f32[16,128], index: 4, kind: output, shape index: {}]  }
   0x1   :  { %10 = vsyncpa [#allocation6], 0 }
   0x2   :  { %11 = vsyncpa [#allocation4], 0  ;;  %s211_s15 = smov [#allocation2]  }
   0x3   :  { %s17_s16 = sshll.u32 %s211_s15, 4  ;;  %s18_s16 = int_to_ptr.vmem [resolvable:$true] %s17_s16 }
   0x4   :  { %s153_s17 = scalar_lea.vmem %s18_s16, 256  ;;  %p158_p1 = scmp.lt.s32.totalorder %s18_s16, %s18_s16 }
   0x5   :  { %p154_p0 = scmp.ne.s32.totalorder %s18_s16, %s153_s17  ;;  %p159_p2 = scmp.lt.s32.totalorder %s153_s17, %s153_s17 }
   0x7   :  { %p160_p3 = por %p159_p2, %p158_p1 }
   0x9   :  { %p161_p4 = pnand %p160_p3, %p154_p0 }
   0xb   :  { %164 = shalt.err (!%p161_p4)
}
   0xc   :  { %s212_s18 = smov 128   ;;  %s213_s19 = smov 8  }
   0xd   :  { %23 = dma.hbm_to_vmem [thread:$0]  %s265_s0, 256, %s18_s16, [#allocation3], %s212_s18, %s212_s18, %s213_s19  }
   0xe   :  { %s214_s22 = smov [#allocation5]  }
   0xf   :  { %s29_s23 = sshll.u32 %s214_s22, 4  ;;  %s30_s23 = int_to_ptr.vmem [resolvable:$true] %s29_s23 }
  0x10   :  { %s173_s24 = scalar_lea.vmem %s30_s23, 256  ;;  %p178_p6 = scmp.lt.s32.totalorder %s30_s23, %s30_s23 }
  0x11   :  { %p174_p5 = scmp.ne.s32.totalorder %s30_s23, %s173_s24  ;;  %p179_p7 = scmp.lt.s32.totalorder %s173_s24, %s173_s24 }
  0x13   :  { %p180_p8 = por %p179_p7, %p178_p6 }
  0x15   :  { %p181_p9 = pnand %p180_p8, %p174_p5 }
  0x17   :  { %184 = shalt.err (!%p181_p9)
}
  0x18   :  { %35 = dma.hbm_to_vmem [thread:$0]  %s266_s1, 256, %s30_s23, [#allocation6], %s212_s18, %s212_s18, %s213_s19  }
  0x19   :  { %205 = dma.done.wait [#allocation3], 256  }
  0x1a   :  { %206 = vsyncadd [#allocation3], 4294967040 }
  0x1b   :  { %207 = dma.done.wait [#allocation6], 256  }
  0x1c   :  { %208 = vsyncadd [#allocation6], 4294967040  ;;  %v46_v0 = vld [vmem:[#allocation2] sm:$0xff]  ;;  %v48_v1 = vld [vmem:[#allocation5] sm:$0xff]  ;;  %s215_s29 = smov [#allocation7]  }
  0x1d   :  { %v47_v2 = vld [vmem:[#allocation2 + $0x8] sm:$0xff]  ;;  %v50_v3 = vadd.f32 %v48_v1, %v46_v0  ;;  %v49_v4 = vld [vmem:[#allocation5 + $0x8] sm:$0xff]  ;;  %v130_v31 = vld [vmem:[%s267_s2] ss:$0 sm:$0xff]  ;;  %s117_s30 = sshll.u32 %s215_s29, 4  ;;  %s118_s30 = int_to_ptr.vmem [resolvable:$true] %s117_s30 }
  0x1e   :  { %v51_v5 = vadd.f32 %v49_v4, %v47_v2  ;;  %v131_v33 = vld [vmem:[%s268_s3] ss:$0 sm:$0xff]  ;;  %s185_s5 = scalar_lea.vmem %s118_s30, 256  ;;  %p190_p11 = scmp.lt.s32.totalorder %s118_s30, %s118_s30 }
  0x1f   :  { %52 = vadd.xlane.f32.xlu0 %v50_v3  ;;  %p186_p10 = scmp.ne.s32.totalorder %s118_s30, %s185_s5  ;;  %p191_p12 = scmp.lt.s32.totalorder %s185_s5, %s185_s5 }
  0x21   :  { %p192_p13 = por %p191_p12, %p190_p11 }
  0x23   :  { %54 = vadd.xlane.f32.xlu0 %v51_v5  ;;  %p193_p0 = pnand %p192_p13, %p186_p10 }
  0xa8   :  { %v53_v6 = vpop.xlane.xlu0 %52 }
  0xa9   :  { %v57_v7 = vmul.f32 0.0078125, %v53_v6 }
  0xab   :  { %v59_v8 = vsub.f32 %v50_v3, %v57_v7 }
  0xac   :  { %v55_v9 = vpop.xlane.xlu0 %54 }
  0xad   :  { %v58_v10 = vmul.f32 0.0078125, %v55_v9  ;;  %v61_v11 = vmul.f32 %v59_v8, %v59_v8 }
  0xaf   :  { %v60_v12 = vsub.f32 %v51_v5, %v58_v10  ;;  %63 = vadd.xlane.f32.xlu1 %v61_v11 }
  0xb1   :  { %v62_v13 = vmul.f32 %v60_v12, %v60_v12 }
  0xb3   :  { %65 = vadd.xlane.f32.xlu1 %v62_v13 }
 0x138   :  { %v64_v14 = vpop.xlane.xlu1 %63 }
 0x139   :  { %v68_v15 = vmul.f32 0.007874016, %v64_v14 }
 0x13b   :  { %137 = vrsqrt.f32 %v68_v15  ;;  %vm72_vm0 = vcmp.eq.f32.partialorder %v68_v15, inf  ;;  %v75_v20 = vand.u32 2147483648, %v68_v15  ;;  %vm74_vm1 = vcmp.eq.f32.partialorder %v68_v15, 0.0 }
 0x13c   :  { %v66_v16 = vpop.xlane.xlu1 %65 }
 0x13d   :  { %v69_v17 = vmul.f32 0.007874016, %v66_v16 }
 0x13f   :  { %139 = vrsqrt.f32 %v69_v17  ;;  %vm79_vm2 = vcmp.eq.f32.partialorder %v69_v17, inf  ;;  %v82_v26 = vand.u32 2147483648, %v69_v17  ;;  %vm81_vm3 = vcmp.eq.f32.partialorder %v69_v17, 0.0 }
 0x148   :  { %v138_v18 = vpop.eup %137 }
 0x149   :  { %v71_v19 = vmul.f32 %v138_v18, %v68_v15 }
 0x14b   :  { %v73_v21 = vsel %vm72_vm0, %v68_v15, %v71_v19 }
 0x14c   :  { %v140_v22 = vpop.eup %139  ;;  %v76_v23 = vsel %vm74_vm1, %v75_v20, %v73_v21 }
 0x14d   :  { %v84_v24 = vadd.f32 1e-06, %v76_v23  ;;  %v78_v25 = vmul.f32 %v140_v22, %v69_v17 }
 0x14f   :  { %141 = vrcp.f32 %v84_v24  ;;  %v80_v27 = vsel %vm79_vm2, %v69_v17, %v78_v25 }
 0x150   :  { %v83_v28 = vsel %vm81_vm3, %v82_v26, %v80_v27 }
 0x151   :  { %v85_v29 = vadd.f32 1e-06, %v83_v28 }
 0x153   :  { %143 = vrcp.f32 %v85_v29 }
 0x15c   :  { %v142_v30 = vpop.eup %141 }
 0x15d   :  { %v91_v32 = vmul.f32 %v142_v30, %v59_v8 }
 0x15f   :  { %v99_v34 = vmul.f32 %v130_v31, %v91_v32 }
 0x160   :  { %v144_v35 = vpop.eup %143 }
 0x161   :  { %v92_v36 = vmul.f32 %v144_v35, %v60_v12  ;;  %v108_v37 = vadd.f32 %v131_v33, %v99_v34 }
 0x163   :  { %v100_v38 = vmul.f32 %v130_v31, %v92_v36  ;;  %110 = vst [vmem:[#allocation7] sm:$0xff] %v108_v37 }
 0x165   :  { %v109_v39 = vadd.f32 %v131_v33, %v100_v38 }
 0x167   :  { %111 = vst [vmem:[#allocation7 + $0x8] sm:$0xff] %v109_v39 }
 0x168   :  { %196 = shalt.err (!%p193_p0)
}
 0x169   :  { %123 = dma.vmem_to_hbm [thread:$0]  %s118_s30, 256, %s269_s4, [#allocation4], %s212_s18, %s212_s18, %s213_s19  }
 0x16a   :  { %209 = dma.done.wait [#allocation4], 256  }
 0x16b   :  { %210 = vsyncadd [#allocation4], 4294967040 }
 0x16c   :  { %127 = vsyncpa [#allocation3], 1 }
 0x16d   :  { %128 = vsyncpa [#allocation6], 1 }
 0x16e   :  { %129 = vsyncpa [#allocation4], 1 }

</bundles_post_ra>
